<compile_context>
chip_gen: v6e
topology: v6e:2x2x1
jax: 0.10.0
libtpu: 0.0.40
codegen_flags: <defaults>
</compile_context>

<pallas_src>
import functools

import jax
import jax.numpy as jnp
from jax.experimental import pallas as pl
from jax.experimental.pallas import tpu as pltpu


def _pick_tile_rows(rows, cols, target_bytes=1 << 20):
    """Largest row-tile that divides `rows`, is a multiple of 8, and keeps a
    single f32 block <= target_bytes."""
    best = 8
    for t in range(8, rows + 1, 8):
        if rows % t == 0 and t * cols * 4 <= target_bytes:
            best = t
    return best


def pmc_pnp_kernel(x_ref, y_ref, m_ref, n_ref, c_ref, o_ref, acc_ref,
                   *, gamma, noise_std):
    k = pl.program_id(1)          # annealing iteration (innermost grid axis)

    # First iteration for this tile: load x into the resident VMEM accumulator.
    @pl.when(k == 0)
    def _():
        acc_ref[...] = x_ref[...]

    x = acc_ref[...]
    y = y_ref[...]
    m = m_ref[...].astype(x.dtype)          # int8 {0,1} mask -> f32
    c = c_ref[k]                            # 1 - gamma*alpha_k/sigma_k^2 (SMEM scalar)

    # lhood = A^T(Ax - y) = m*(m*x - y)
    # x_{k+1} = x - gamma*(lhood - lprior) + noise
    #         = c * (x - gamma*lhood) + noise_std * n_k        (folded form)
    acc_ref[...] = c * (x - gamma * (m * (m * x - y))) + noise_std * n_ref[...]

    # Last iteration: write the final iterate back to HBM (aliased onto x).
    @pl.when(k == pl.num_programs(1) - 1)
    def _():
        o_ref[...] = acc_ref[...]


def pmc_pnp_anneal(x, y, mask, noise, sigmas, alphas, *, gamma, start_iter=0):
    """Run K fused PMC-PnP annealing iterations (K = noise.shape[0]).

    x, y, mask : (N, C, H, W) float32
    noise      : (K, N, C, H, W) float32, standard normal (unit variance)
    sigmas, alphas : (L,) schedules; iteration k uses index (start_iter+k) % L
    """
    N, C, H, W = x.shape
    K = noise.shape[0]
    rows, cols = N * C, H * W
    assert rows % 8 == 0 and cols % 128 == 0, \
        "need (N*C) % 8 == 0 and (H*W) % 128 == 0"

    x2 = x.reshape(rows, cols)
    y2 = y.reshape(rows, cols)
    m2 = (mask != 0).astype(jnp.int8).reshape(rows, cols)   # 1 B/elem mask
    n2 = noise.reshape(K, rows, cols)

    # Per-iteration folded coefficient, following the module's iter cycling.
    it = (start_iter + jnp.arange(K)) % sigmas.shape[0]
    sig = sigmas[it].astype(jnp.float32)
    alp = alphas[it].astype(jnp.float32)
    coeffs = (1.0 - gamma * alp / (sig * sig)).astype(jnp.float32)   # (K,), SMEM

    tile_rows = _pick_tile_rows(rows, cols)
    num_tiles = rows // tile_rows

    kernel = functools.partial(
        pmc_pnp_kernel,
        gamma=float(gamma),
        noise_std=float((2.0 * gamma) ** 0.5),
    )

    cost = pl.CostEstimate(
        flops=8 * K * rows * cols,
        transcendentals=0,
        # x + y + out (f32) + mask (int8) + K noise slices (f32)
        bytes_accessed=rows * cols * (13 + 4 * K),
    )

    out2 = pl.pallas_call(
        kernel,
        out_shape=jax.ShapeDtypeStruct((rows, cols), x.dtype),
        grid=(num_tiles, K),
        in_specs=[
            pl.BlockSpec((tile_rows, cols), lambda i, k: (i, 0)),            # x
            pl.BlockSpec((tile_rows, cols), lambda i, k: (i, 0)),            # y
            pl.BlockSpec((tile_rows, cols), lambda i, k: (i, 0)),            # mask int8
            pl.BlockSpec((None, tile_rows, cols), lambda i, k: (k, i, 0)),   # noise[k]
            pl.BlockSpec(memory_space=pltpu.MemorySpace.SMEM),               # coeffs
        ],
        out_specs=pl.BlockSpec((tile_rows, cols), lambda i, k: (i, 0)),
        scratch_shapes=[pltpu.VMEM((tile_rows, cols), jnp.float32)],
        input_output_aliases={0: 0},          # update x in place
        compiler_params=pltpu.CompilerParams(
            dimension_semantics=("parallel", "arbitrary")),
        cost_estimate=cost,
    )(x2, y2, m2, n2, coeffs)

    return out2.reshape(N, C, H, W)


if __name__ == "__main__":
    key = jax.random.PRNGKey(0)
    kx, ky, km, kn = jax.random.split(key, 4)

    N, C, H, W = 2, 4, 16, 16
    K = 8                     # fused annealing iterations
    gamma = 0.05

    x = jax.random.normal(kx, (N, C, H, W), dtype=jnp.float32)
    mask = (jax.random.uniform(km, (N, C, H, W)) > 0.3).astype(jnp.float32)
    # measurements y = A x + small noise
    y = mask * x + 0.01 * jax.random.normal(ky, (N, C, H, W), dtype=jnp.float32)

    sigmas = jnp.linspace(0.5, 0.1, K, dtype=jnp.float32)   # annealing schedule
    alphas = jnp.ones((K,), dtype=jnp.float32)
    noise = jax.random.normal(kn, (K, N, C, H, W), dtype=jnp.float32)

    # Pure-JAX reference: K sequential calls of the PyTorch forward().
    noise_std = (2.0 * gamma) ** 0.5
    expected = x
    for k in range(K):
        lhood = mask * (mask * expected - y)
        lprior = -((expected - gamma * lhood) / (sigmas[k] ** 2)) * alphas[k]
        expected = expected - gamma * (lhood - lprior) + noise[k] * noise_std

    out = pmc_pnp_anneal(x, y, mask, noise, sigmas, alphas, gamma=gamma)
    out = jax.block_until_ready(out)

    assert out.shape == (N, C, H, W) and out.dtype == jnp.float32
    assert bool(jnp.all(jnp.isfinite(out)))
    assert bool(jnp.allclose(out, expected, rtol=1e-4, atol=1e-4)), \
        float(jnp.max(jnp.abs(out - expected)))
    print("KERNEL_OK")
</pallas_src>

<mosaic_0001>
module attributes {stable_mosaic.version = 11 : i64} {
  func.func @pmc_pnp_kernel(%arg0: i32, %arg1: i32, %arg2: memref<8x256xf32, #tpu.memory_space<vmem>>, %arg3: memref<8x256xf32, #tpu.memory_space<vmem>>, %arg4: memref<8x256xi8, #tpu.memory_space<vmem>>, %arg5: memref<1x8x256xf32, #tpu.memory_space<vmem>>, %arg6: memref<8xf32, #tpu.memory_space<smem>>, %arg7: memref<8x256xf32, #tpu.memory_space<vmem>>, %arg8: memref<8x256xf32, #tpu.memory_space<vmem>>) attributes {dimension_semantics = [#tpu.dimension_semantics<parallel>, #tpu.dimension_semantics<arbitrary>], iteration_bounds = array<i64: 1, 8>, scalar_prefetch = 0 : i64, scratch_operands = 1 : i64, tpu.core_type = #tpu.core_type<tc>, window_params = [{transform_indices = @transform_0, window_bounds = array<i64: 8, 256>}, {transform_indices = @transform_1, window_bounds = array<i64: 8, 256>}, {transform_indices = @transform_2, window_bounds = array<i64: 8, 256>}, {transform_indices = @transform_3, window_bounds = array<i64: 1, 8, 256>}, {transform_indices = @transform_4, window_bounds = array<i64: 8>}, {transform_indices = @transform_5, window_bounds = array<i64: 8, 256>}]} {
    %c0_i32 = arith.constant 0 : i32
    %0 = arith.cmpi eq, %arg1, %c0_i32 : i32
    %1 = arith.extui %0 : i1 to i32
    %c0_i32_0 = arith.constant 0 : i32
    %2 = arith.cmpi ne, %1, %c0_i32_0 : i32
    scf.if %2 {
      %c0_13 = arith.constant 0 : index
      %c0_14 = arith.constant 0 : index
      %26 = vector.load %arg2[%c0_13, %c0_14] : memref<8x256xf32, #tpu.memory_space<vmem>>, vector<8x256xf32>
      %c0_15 = arith.constant 0 : index
      %c0_16 = arith.constant 0 : index
      %27 = vector.load %arg8[%c0_15, %c0_16] : memref<8x256xf32, #tpu.memory_space<vmem>>, vector<8x256xf32>
      tpu.vector_store %arg8[%c0_15, %c0_16], %26 {strides = array<i32>} : memref<8x256xf32, #tpu.memory_space<vmem>>, vector<8x256xf32>,
    } else {
    }
    %c0 = arith.constant 0 : index
    %c0_1 = arith.constant 0 : index
    %3 = vector.load %arg8[%c0, %c0_1] : memref<8x256xf32, #tpu.memory_space<vmem>>, vector<8x256xf32>
    %c0_2 = arith.constant 0 : index
    %c0_3 = arith.constant 0 : index
    %4 = vector.load %arg3[%c0_2, %c0_3] : memref<8x256xf32, #tpu.memory_space<vmem>>, vector<8x256xf32>
    %c0_4 = arith.constant 0 : index
    %c0_5 = arith.constant 0 : index
    %5 = vector.load %arg4[%c0_4, %c0_5] : memref<8x256xi8, #tpu.memory_space<vmem>>, vector<8x256xi8>
    %6 = arith.sitofp %5 : vector<8x256xi8> to vector<8x256xf32>
    %7 = arith.index_cast %arg1 : i32 to index
    %8 = memref.load %arg6[%7] : memref<8xf32, #tpu.memory_space<smem>>
    %9 = arith.mulf %6, %3 : vector<8x256xf32>
    %10 = arith.subf %9, %4 : vector<8x256xf32>
    %11 = arith.mulf %6, %10 : vector<8x256xf32>
    %cst = arith.constant 5.000000e-02 : f32
    %12 = vector.broadcast %cst : f32 to vector<8x256xf32>
    %13 = arith.mulf %12, %11 : vector<8x256xf32>
    %14 = arith.subf %3, %13 : vector<8x256xf32>
    %15 = vector.broadcast %8 : f32 to vector<8x256xf32>
    %16 = arith.mulf %15, %14 : vector<8x256xf32>
    %c0_6 = arith.constant 0 : index
    %c0_7 = arith.constant 0 : index
    %c0_8 = arith.constant 0 : index
    %17 = vector.load %arg5[%c0_6, %c0_7, %c0_8] : memref<1x8x256xf32, #tpu.memory_space<vmem>>, vector<1x8x256xf32>
    %18 = vector.shape_cast %17 : vector<1x8x256xf32> to vector<8x256xf32>
    %cst_9 = arith.constant 0.316227764 : f32
    %19 = vector.broadcast %cst_9 : f32 to vector<8x256xf32>
    %20 = arith.mulf %19, %18 : vector<8x256xf32>
    %21 = arith.addf %16, %20 : vector<8x256xf32>
    %c0_10 = arith.constant 0 : index
    %c0_11 = arith.constant 0 : index
    %22 = vector.load %arg8[%c0_10, %c0_11] : memref<8x256xf32, #tpu.memory_space<vmem>>, vector<8x256xf32>
    tpu.vector_store %arg8[%c0_10, %c0_11], %21 {strides = array<i32>} : memref<8x256xf32, #tpu.memory_space<vmem>>, vector<8x256xf32>,
    %c7_i32 = arith.constant 7 : i32
    %23 = arith.cmpi eq, %arg1, %c7_i32 : i32
    %24 = arith.extui %23 : i1 to i32
    %c0_i32_12 = arith.constant 0 : i32
    %25 = arith.cmpi ne, %24, %c0_i32_12 : i32
    scf.if %25 {
      %c0_13 = arith.constant 0 : index
      %c0_14 = arith.constant 0 : index
      %26 = vector.load %arg8[%c0_13, %c0_14] : memref<8x256xf32, #tpu.memory_space<vmem>>, vector<8x256xf32>
      %c0_15 = arith.constant 0 : index
      %c0_16 = arith.constant 0 : index
      %27 = vector.load %arg7[%c0_15, %c0_16] : memref<8x256xf32, #tpu.memory_space<vmem>>, vector<8x256xf32>
      tpu.vector_store %arg7[%c0_15, %c0_16], %26 {strides = array<i32>} : memref<8x256xf32, #tpu.memory_space<vmem>>, vector<8x256xf32>,
    } else {
    }
    return
  }
  func.func @transform_0(%arg0: i32, %arg1: i32) -> (i32, i32) {
    %c0_i32 = arith.constant 0 : i32
    %c0_i32_0 = arith.constant 0 : i32
    return %arg0, %c0_i32 : i32, i32
  }
  func.func @transform_1(%arg0: i32, %arg1: i32) -> (i32, i32) {
    %c0_i32 = arith.constant 0 : i32
    %c0_i32_0 = arith.constant 0 : i32
    return %arg0, %c0_i32 : i32, i32
  }
  func.func @transform_2(%arg0: i32, %arg1: i32) -> (i32, i32) {
    %c0_i32 = arith.constant 0 : i32
    %c0_i32_0 = arith.constant 0 : i32
    return %arg0, %c0_i32 : i32, i32
  }
  func.func @transform_3(%arg0: i32, %arg1: i32) -> (i32, i32, i32) {
    %c0_i32 = arith.constant 0 : i32
    %c0_i32_0 = arith.constant 0 : i32
    return %arg1, %arg0, %c0_i32 : i32, i32, i32
  }
  func.func @transform_4(%arg0: i32, %arg1: i32) -> i32 {
    %c0_i32 = arith.constant 0 : i32
    %c0_i32_0 = arith.constant 0 : i32
    return %c0_i32 : i32
  }
  func.func @transform_5(%arg0: i32, %arg1: i32) -> (i32, i32) {
    %c0_i32 = arith.constant 0 : i32
    %c0_i32_0 = arith.constant 0 : i32
    return %arg0, %c0_i32 : i32, i32
  }
}

</mosaic_0001>

<bundles_post_ra>
// kernel: tpu_custom_call.1
= control target key start
LH: loop header
LB: loop body
LE: loop exit
PB: predicated region body
PF: predicated region fallthrough
CT: control target
= control target key end

     0   :  { %10 = vsyncpa [#allocation4], 0  ;;  %s964_s0 = inlined_call_operand.hbm [shape: f32[8,256], index: 0, kind: input, shape index: {}, may-alias: {0,5}]   ;;  %s965_s1 = inlined_call_operand.vmem [shape: f32[8,256], index: 1, kind: input, shape index: {}]   ;;  %s966_s2 = inlined_call_operand.vmem [shape: s8[8,256], index: 2, kind: input, shape index: {}]   ;;  %s967_s3 = inlined_call_operand.hbm [shape: f32[8,8,256], index: 3, kind: input, shape index: {}]   ;;  %s968_s4 = inlined_call_operand.vmem [shape: f32[8], index: 4, kind: input, shape index: {}]   ;;  %s969_s5 = inlined_call_operand.hbm [shape: f32[8,256], index: 5, kind: output, shape index: {}, may-alias: {0,5}]  }
   0x1   :  { %11 = vsyncpa [#allocation8], 0 }
   0x2   :  { %13 = vsyncpa [#allocation8 + $0x1], 0 }
   0x3   :  { %14 = vsyncpa [#allocation6], 0 }
   0x4   :  { %15 = vsyncpa [#allocation5], 0  ;;  %s797_s18 = smov 0   ;;  %s799_s19 = smov 0  }
   0x5   :  { %s801_s20 = smov 0   ;;  %s803_s21 = smov 0  }
   0x6   :  { %s805_s22 = smov 0   ;;  %s807_s23 = smov 0  }
   0x7 LB: > { %s502_s24 = sadd.s32 4294967295, %s761_s23   ;;  %p133_p0 = scmp.ne.s32.totalorder %s745_s19, %s741_s18  ;;  %s761_s23 = sphi %s807_s23, %s21_s23   ;;  %s757_s22 = sphi %s805_s22, %s987_s22   ;;  %s753_s21 = sphi %s803_s21, %s986_s21   ;;  %s749_s20 = sphi %s801_s20, %s985_s20   ;;  %s745_s19 = sphi %s799_s19, %s984_s19   ;;  %s741_s18 = sphi %s797_s18, %s983_s18  }
   0x8   : > { %p829_p1 = scmp.eq.s32.totalorder %s502_s24, 0  ;;  %p503_p2 = scmp.ge.s32.totalorder %s761_s23, 1 }
   0x9   : > { %p191_p3 = scmp.lt.s32.totalorder %s761_s23, 9  ;;  %s763_s28 = smov [#allocation3]  }
   0xa   : > { %s974_s25 = scalar_select %p829_p1, 1, 0 }
   0xb   : > { %p837_p4 = por %p829_p1, %p133_p0  ;;  %p841_p5 = pnand %p503_p2, %p191_p3 }
   0xc   : > { %s207_s29 = sshll.u32 %s763_s28, 4  ;;  %s234_s7 = sshll.u32 %s968_s4, 4  ;;  %s208_s29 = int_to_ptr.vmem [resolvable:$true] %s207_s29  ;;  %s235_s7 = int_to_ptr.vmem [resolvable:$true] %s234_s7 }
   0xd   : > { %s975_s26 = scalar_select %p837_p4, 1, 0 }
   0xe   : > { %s976_s27 = scalar_select %p841_p5, 1, 0 }
   0xf   : > { %p537_p6 = pneg %p841_p5  ;;  %s617_s9 = scalar_lea.vmem %s208_s29, 256 }
  0x10   : > { %p618_p9 = scmp.ne.s32.totalorder %s208_s29, %s617_s9  ;;  %p625_p12 = scmp.lt.s32.totalorder %s208_s29, %s208_s29 }
  0x11   : > { %p852_p7 = pnand %p537_p6, %p829_p1  ;;  %p626_p13 = scmp.lt.s32.totalorder %s617_s9, %s617_s9 }
  0x13   : > { %p608_p8 = pneg %p852_p7  ;;  %p627_p0 = por %p626_p13, %p625_p12 }
  0x15   : > { %p620_p10 = pnand %p618_p9, %p608_p8 }
  0x17   : > { %p621_p11 = pneg %p620_p10 }
  0x19   : > { %p628_p2 = pnand %p627_p0, %p621_p11 }
  0x1b   : > { %631 = shalt.err (!%p628_p2)
}
  0x1c   : > { %540 = dma.hbm_to_vmem [thread:$0]  (!%p852_p7), %s964_s0, 256, %s208_s29, [#allocation4]  }
  0x1d   : > { %s632_s12 = scalar_lea.vmem %s235_s7, 16  ;;  %p640_p9 = scmp.lt.s32.totalorder %s235_s7, %s235_s7 }
  0x1e   : > { %p633_p3 = scmp.ne.s32.totalorder %s235_s7, %s632_s12  ;;  %p641_p10 = scmp.lt.s32.totalorder %s632_s12, %s632_s12 }
  0x20   : > { %p635_p6 = pnand %p633_p3, %p608_p8  ;;  %p642_p1 = por %p641_p10, %p640_p9 }
  0x22   : > { %p636_p4 = pneg %p635_p6 }
  0x24   : > { %p643_p5 = pnand %p642_p1, %p636_p4 }
  0x26   : > { %646 = shalt.err (!%p643_p5)
}
  0x27   : > { %s764_s13 = smov [#allocation9]   ;;  %s30_s14 = sadd.s32 1, %s757_s22 }
  0x28   : > { %543 = dma.vmem_to_smem (!%p852_p7), %s235_s7, 16, %s764_s13, [#allocation6]  }
  0x29   : > { %s120_s15 = sadd.s32 1, %s749_s20  ;;  %p31_p8 = scmp.ge.s32.totalorder %s30_s14, 8 }
  0x2a   : > { %p127_p1 = scmp.ne.s32.totalorder %s749_s20, %s745_s19  ;;  %p128_p4 = scmp.eq.s32.totalorder %s761_s23, 0 }
  0x2b   : > { %p550_p5 = scmp.lt.s32.totalorder %s761_s23, 8  ;;  %s989_s14 = smov (%p31_p8, %s30_s14), 0 }
  0x2c   : > { %p129_p11 = por %p128_p4, %p127_p1  ;;  %s245_s16 = sand.u32 1, %s749_s20  }
  0x2d   : > { %s115_s17 = ssub.s32 %s757_s22, %s989_s14  ;;  %s509_s18 = sshll.u32 %s245_s16, 4 }
  0x2e   : > { %p118_p12 = scmp.eq.s32.totalorder %s115_s17, 0  ;;  %s522_s28 = sshll.u32 %s757_s22, 8 }
  0x2f   : > { %s257_s7 = scalar_lea.hbm %s967_s3, %s522_s28  ;;  %s249_s8 = scalar_lea.vmem [#allocation7], %s509_s18 }
  0x30   : > { %s884_s29 = scalar_select %p118_p12, %s749_s20, %s120_s15  }
  0x31   : > { %s259_s9 = sshll.u32 %s249_s8, 4  ;;  %p891_p7 = pnand %p550_p5, %p129_p11  ;;  %s260_s9 = int_to_ptr.vmem [resolvable:$true] %s259_s9 }
  0x32   : > { %s246_s11 = scalar_lea.sflag [#allocation8], %s245_s16  ;;  %s660_s12 = scalar_lea.vmem %s260_s9, 256 }
  0x33   : > { %p649_p13 = pneg %p891_p7  ;;  %p661_p0 = scmp.ne.s32.totalorder %s260_s9, %s660_s12 }
  0x34   : > { %s765_s13 = smov [#allocation7]  }
  0x35   : > { %p663_p2 = pnand %p661_p0, %p649_p13  ;;  %s665_s15 = sshll.u32 %s765_s13, 4  ;;  %s666_s15 = int_to_ptr.vmem [resolvable:$false] %s665_s15 }
  0x36   : > { %s667_s17 = scalar_lea.vmem %s666_s15, 512  ;;  %p668_p6 = scmp.lt.s32.totalorder %s260_s9, %s666_s15 }
  0x37   : > { %p664_p3 = pneg %p663_p2  ;;  %p669_p9 = scmp.lt.s32.totalorder %s667_s17, %s660_s12 }
  0x39   : > { %p670_p10 = por %p669_p9, %p668_p6 }
  0x3b   : > { %p671_p8 = pnand %p670_p10, %p664_p3 }
  0x3d   : > { %674 = shalt.err (!%p671_p8)
}
  0x3e   : > { %547 = dma.hbm_to_vmem [thread:$0]  (!%p891_p7), %s257_s7, 256, %s260_s9, %s246_s11  }
  0x3f   : > { %p979_p1 = scmp.ne.s32.totalorder %s976_s27, 0 }
  0x40   : > { %p980_p4 = scmp.ne.s32.totalorder (!%p979_p1), %s974_s25, 0 }
  0x41   : > { %268 = sbr.rel (%p979_p1) target bundleno = 133 (0x85), region = 40 }
  0x46   : > { %724 = dma.done.wait (%p980_p4), [#allocation4], 256  }
  0x47   : > { %726 = vsyncadd (%p980_p4), [#allocation4], 4294967040  ;;  %s274_s16 = sand.u32 1, %s745_s19   ;;  %p981_p5 = scmp.ne.s32.totalorder %s975_s26, 0 }
  0x48   : > { %s906_s18 = sshll.u32 %s274_s16, 4  ;;  %s275_s28 = scalar_lea.sflag [#allocation8], %s274_s16 }
  0x49   : > { %s278_s30 = scalar_lea.vmem [#allocation7], %s906_s18 }
  0x4a   : > { %728 = dma.done.wait (%p981_p5), %s275_s28, 256  }
  0x4b   : > { %730 = vsyncadd (%p981_p5), %s275_s28, 4294967040 }
  0x4c   : > { %732 = dma.done.wait (%p980_p4), [#allocation6], 16  }
  0x4d   : > { %734 = vsyncadd (%p980_p4), [#allocation6], 4294967280 }
  0x4e   : > { %287 = sfence }
  0x4f   : > { %p516_p11 = scmp.ne.s32.totalorder %s753_s21, 0 }
  0x51   : > { %328 = sbr.rel (%p516_p11) target bundleno = 88 (0x58), region = 56 }
  0x56   : > { %v329_v0 = vld [vmem:[#allocation3] sm:$0xff]  ;;  %v330_v1 = vld [vmem:[#allocation3 + $0x8] sm:$0xff] }
  0x57   : > { %331 = vst [vmem:[#allocation2] sm:$0xff] %v329_v0  ;;  %332 = vst [vmem:[#allocation2 + $0x8] sm:$0xff] %v330_v1 }
  0x58 PF: > { %v337_v2 = vld [vmem:[%s966_s2] sm:$0xf]  ;;  %s342_s7 = sld [smem:[#allocation9 + %s753_s21]]  ;;  %v336_v10 = vld [vmem:[%s965_s1 + $0x8] sm:$0xff]  ;;  %p517_p12 = scmp.ne.s32.totalorder %s753_s21, 7 }
  0x59   : > { %v338_v3 = vunpack.c.0.s8 %v337_v2  ;;  %v339_v4 = vunpack.c.1.s8 %v337_v2  ;;  %v335_v9 = vld [vmem:[%s965_s1] sm:$0xff]  ;;  %v357_v18 = vld [vmem:[%s278_s30 + $0x8] sm:$0xff] }
  0x5a   : > { %v356_v17 = vld [vmem:[%s278_s30] sm:$0xff]  ;;  %v359_v25 = vmul.f32 0.31622776, %v357_v18 }
  0x5b   : > { %v340_v7 = vcvt.s32.f32 %v338_v3  ;;  %v341_v8 = vcvt.s32.f32 %v339_v4  ;;  %v358_v23 = vmul.f32 0.31622776, %v356_v17 }
  0x5e   : > { %v333_v5 = vld [vmem:[#allocation2] sm:$0xff]  ;;  %v334_v6 = vld [vmem:[#allocation2 + $0x8] sm:$0xff]  ;;  %v353_v21 = vstv %s342_s7 }
  0x5f   : > { %v343_v11 = vmul.f32 %v340_v7, %v333_v5  ;;  %v344_v12 = vmul.f32 %v341_v8, %v334_v6 }
  0x61   : > { %v345_v13 = vsub.f32 %v343_v11, %v335_v9  ;;  %v346_v14 = vsub.f32 %v344_v12, %v336_v10 }
  0x63   : > { %v347_v15 = vmul.f32 %v345_v13, %v340_v7  ;;  %v348_v16 = vmul.f32 %v346_v14, %v341_v8 }
  0x65   : > { %v349_v19 = vmul.f32 0.05, %v347_v15  ;;  %v350_v20 = vmul.f32 0.05, %v348_v16 }
  0x67   : > { %v351_v22 = vsub.f32 %v333_v5, %v349_v19  ;;  %v352_v24 = vsub.f32 %v334_v6, %v350_v20 }
  0x69   : > { %v354_v26 = vmul.f32 %v353_v21, %v351_v22  ;;  %v355_v27 = vmul.f32 %v353_v21, %v352_v24  ;;  %367 = sbr.rel (%p517_p12) target bundleno = 118 (0x76), region = 60 }
  0x6b   : > { %v360_v28 = vadd.f32 %v358_v23, %v354_v26  ;;  %v361_v29 = vadd.f32 %v359_v25, %v355_v27 }
  0x6d   : > { %362 = vst [vmem:[#allocation2] sm:$0xff] %v360_v28  ;;  %363 = vst [vmem:[#allocation2 + $0x8] sm:$0xff] %v361_v29 }
  0x74   : > { %v368_v30 = vld [vmem:[#allocation2] sm:$0xff]  ;;  %v369_v31 = vld [vmem:[#allocation2 + $0x8] sm:$0xff] }
  0x75   : > { %370 = vst [vmem:[#allocation10] sm:$0xff] %v368_v30  ;;  %371 = vst [vmem:[#allocation10 + $0x8] sm:$0xff] %v369_v31 }
  0x76 PF: > { %p931_p7 = scmp.eq.s32.totalorder %s502_s24, 7  ;;  %s766_s11 = smov [#allocation10]  }
  0x77   : > { %s382_s12 = sshll.u32 %s766_s11, 4  ;;  %s383_s12 = int_to_ptr.vmem [resolvable:$true] %s382_s12 }
  0x78   : > { %s675_s13 = scalar_lea.vmem %s383_s12, 256  ;;  %p682_p3 = scmp.lt.s32.totalorder %s383_s12, %s383_s12 }
  0x79   : > { %p676_p13 = scmp.ne.s32.totalorder %s383_s12, %s675_s13  ;;  %p683_p6 = scmp.lt.s32.totalorder %s675_s13, %s675_s13 }
  0x7b   : > { %p677_p0 = pnand %p676_p13, %p931_p7  ;;  %p684_p9 = por %p683_p6, %p682_p3 }
  0x7d   : > { %p678_p2 = pneg %p677_p0 }
  0x7f   : > { %p685_p10 = pnand %p684_p9, %p678_p2 }
  0x81   : > { %688 = shalt.err (!%p685_p10)
}
  0x82   : > { %534 = dma.vmem_to_hbm [thread:$0]  (%p931_p7), %s383_s12, 256, %s969_s5, [#allocation5]  }
  0x83   : > { %736 = dma.done.wait (%p931_p7), [#allocation5], 256  }
  0x84   : > { %738 = vsyncadd (%p931_p7), [#allocation5], 4294967040 }
  0x85 PF: > { %s21_s23 = sadd.s32 1, %s761_s23   ;;  %s983_s18 = smov %s745_s19 }
  0x86   : > { %p18_p8 = scmp.ge.s32.totalorder %s21_s23, 10   ;;  %s984_s19 = smov %s749_s20 }
  0x87   : > { %s985_s20 = smov %s884_s29  ;;  %s986_s21 = smov %s757_s22 }
  0x88   : > { %s987_s22 = smov %s989_s14  ;;  %20 = sbr.rel (!%p18_p8) target bundleno = 7 (0x7), region = 103 }
  0x8d   :  { %395 = vsyncpa [#allocation4], 1 }
  0x8e   :  { %397 = vsyncpa [#allocation4 + $0x1], 1 }
  0x8f   :  { %398 = vsyncpa [#allocation8], 1 }
  0x90   :  { %400 = vsyncpa [#allocation8 + $0x1], 1 }
  0x91   :  { %401 = vsyncpa [#allocation5], 1 }
  0x92   :  { %403 = vsyncpa [#allocation5 + $0x1], 1 }
  0x93   :  { %404 = vsyncpa [#allocation6], 1 }
  0x94   :  { %406 = vsyncpa [#allocation6 + $0x1], 1 }

</bundles_post_ra>
